<compile_context>
chip_gen: v5e
topology: v5e:2x2
jax: 0.10.0
libtpu: 0.0.40
codegen_flags: <defaults>
</compile_context>

<pallas_src>
from functools import partial

import numpy as np
import jax
import jax.numpy as jnp
from jax.experimental import pallas as pl
from jax.experimental.pallas import tpu as pltpu


def _round_up(x, m):
    return ((x + m - 1) // m) * m


def _pad2d(x, rows, cols):
    r, c = x.shape
    return jnp.pad(x, ((0, rows - r), (0, cols - c)))


# ----------------------------------------------------------------------------
# Kernel: grid = (num_z_tiles, num_c_tiles); c axis (innermost) is the matmul
# reduction, z axis carries the u_pos/u_neg accumulation.  Both are carried in
# VMEM scratch, so both axes are "arbitrary" (serial).
# ----------------------------------------------------------------------------
def _clapp_kernel(z_ref, zs_ref, c_ref, wt_ref, out_ref,
                  zhat_acc, upos_acc, uneg_acc, *, n_valid):
    j = pl.program_id(0)          # z-tile index
    i = pl.program_id(1)          # c-tile (reduction) index
    nz = pl.num_programs(0)
    nc = pl.num_programs(1)

    @pl.when(jnp.logical_and(j == 0, i == 0))
    def _():
        upos_acc[...] = jnp.zeros_like(upos_acc)
        uneg_acc[...] = jnp.zeros_like(uneg_acc)

    @pl.when(i == 0)
    def _():
        zhat_acc[...] = jnp.zeros_like(zhat_acc)

    # Partial zhat for this z-tile: bf16 operands, f32 accumulation on the MXU.
    zhat_acc[...] += jnp.dot(c_ref[...], wt_ref[...],
                             preferred_element_type=jnp.float32)

    @pl.when(i == nc - 1)
    def _():
        zh = zhat_acc[...]                                   # (Bp, TZ) f32
        upos_acc[...] += jnp.sum(z_ref[...] * zh, axis=-1, keepdims=True)
        uneg_acc[...] += jnp.sum(zs_ref[...] * zh, axis=-1, keepdims=True)

    @pl.when(jnp.logical_and(j == nz - 1, i == nc - 1))
    def _():
        rows = upos_acc.shape[0]
        valid = jax.lax.broadcasted_iota(jnp.int32, (rows, 1), 0) < n_valid
        terms = (jnp.maximum(1.0 - upos_acc[...], 0.0)
                 + jnp.maximum(1.0 + uneg_acc[...], 0.0))
        loss = jnp.sum(jnp.where(valid, terms, 0.0)) / (2.0 * n_valid)
        out_ref[...] = jnp.full(out_ref.shape, loss, jnp.float32)


def _clapp_fused_loss(z, z_shuf, c_bf16, wt_bf16, n_valid, tz, tc):
    """Mean over all (head, sample) rows of (relu(1-u_pos)+relu(1+u_neg))/2."""
    bp, z_pad = z.shape
    _, c_pad = c_bf16.shape
    nz, nc = z_pad // tz, c_pad // tc

    out = pl.pallas_call(
        partial(_clapp_kernel, n_valid=n_valid),
        out_shape=jax.ShapeDtypeStruct((8, 128), jnp.float32),
        grid_spec=pltpu.PrefetchScalarGridSpec(
            num_scalar_prefetch=0,
            grid=(nz, nc),
            in_specs=[
                pl.BlockSpec((bp, tz), lambda j, i: (0, j)),   # z       (f32)
                pl.BlockSpec((bp, tz), lambda j, i: (0, j)),   # z_shuf  (f32)
                pl.BlockSpec((bp, tc), lambda j, i: (0, i)),   # c       (bf16)
                pl.BlockSpec((tc, tz), lambda j, i: (i, j)),   # W^T     (bf16)
            ],
            out_specs=pl.BlockSpec((8, 128), lambda j, i: (0, 0)),
            scratch_shapes=[
                pltpu.VMEM((bp, tz), jnp.float32),   # zhat tile accumulator
                pltpu.VMEM((bp, 1), jnp.float32),    # u_pos accumulator
                pltpu.VMEM((bp, 1), jnp.float32),    # u_neg accumulator
            ],
        ),
        compiler_params=pltpu.CompilerParams(
            dimension_semantics=("arbitrary", "arbitrary"),
            vmem_limit_bytes=64 * 1024 * 1024,
        ),
    )(z, z_shuf, c_bf16, wt_bf16)
    return out[0, 0]


class CLAPPUnsupervisedHalfMaskingPallas:
    """JAX/Pallas re-implementation of the fixed-mask (random_masking=False)
    path of CLAPPUnsupervisedHalfMasking."""

    def __init__(self, c_in, leng, k_predictions=1, prop_hidden=0.5,
                 detach_c=False, masking_axis='none', seed=0):
        if masking_axis not in ('none', 'space'):
            raise ValueError
        self.k_predictions = k_predictions
        self.detach_c = detach_c
        self.c_in = c_in
        self.leng = leng
        self.input_size = c_in * leng

        if masking_axis == 'space':
            n_shown = max(1, int(leng * (1 - prop_hidden)))
            n_masked = leng - n_shown
            if n_masked <= 0:
                masking_axis = 'none'
        if masking_axis == 'none':
            n_shown = max(1, int(self.input_size * (1 - prop_hidden)))
            n_masked = self.input_size - n_shown
        self.masking_axis = masking_axis
        self.n_shown, self.n_masked = n_shown, n_masked

        z_size = n_shown * c_in if masking_axis == 'space' else n_shown
        c_size = self.input_size - z_size
        self.z_size, self.c_size = z_size, c_size

        # Fixed deterministic masks (one per prediction head), same semantics
        # as rd.choice([True]*n_shown + [False]*n_masked, replace=False).
        rng = np.random.default_rng(seed)
        self.z_idx, self.c_idx = [], []
        for _ in range(k_predictions):
            if masking_axis == 'space':
                flags = np.zeros(leng, dtype=bool)
                flags[rng.permutation(leng)[:n_shown]] = True
                mask2d = np.broadcast_to(flags[None, :], (c_in, leng))
            else:
                flags = np.zeros(self.input_size, dtype=bool)
                flags[rng.permutation(self.input_size)[:n_shown]] = True
                mask2d = flags.reshape(-1, leng)
            flat = mask2d.reshape(-1)
            self.z_idx.append(jnp.asarray(np.nonzero(flat)[0], dtype=jnp.int32))
            self.c_idx.append(jnp.asarray(np.nonzero(~flat)[0], dtype=jnp.int32))

        # Wpred: k x Linear(c_size, z_size, bias=False); torch-default uniform
        # init.  NOTE: the reference forward always uses Wpred[0] (quirk kept).
        wkey = jax.random.PRNGKey(seed + 1)
        bound = 1.0 / np.sqrt(c_size)
        self.weights_t = []
        for _ in range(k_predictions):
            wkey, sub = jax.random.split(wkey)
            w = jax.random.uniform(sub, (z_size, c_size), jnp.float32, -bound, bound)
            self.weights_t.append(w.T)                       # (c_size, z_size)

        # Tile sizes (lane-aligned) + padded feature dims.
        self.tz = min(512, _round_up(z_size, 128))
        self.tc = min(512, _round_up(c_size, 128))
        self.z_pad = _round_up(z_size, self.tz)
        self.c_pad = _round_up(c_size, self.tc)

        # Shared weight used by the kernel: padded, transposed, bf16.
        self.w_t_pad = _pad2d(self.weights_t[0], self.c_pad,
                              self.z_pad).astype(jnp.bfloat16)

        # Per-head deterministic "randperm" keys.
        self.perm_keys = [jax.random.fold_in(jax.random.PRNGKey(seed + 2), k)
                          for k in range(k_predictions)]

    # -- Pallas forward -------------------------------------------------------
    def __call__(self, reprs, y=None):
        b = reprs.shape[0]
        flat = reprs.reshape(b, -1).astype(jnp.float32)

        zs, cs, zss = [], [], []
        for k in range(self.k_predictions):
            z = jnp.take(flat, self.z_idx[k], axis=1)        # (b, z_size)
            c = jnp.take(flat, self.c_idx[k], axis=1)        # (b, c_size)
            if self.detach_c:
                c = jax.lax.stop_gradient(c)
            # zhat[idx] pairing realised as a gather on z with the inverse
            # permutation (the mean over the batch is identical).
            idx = jax.random.permutation(self.perm_keys[k], b)
            inv = jnp.argsort(idx)
            zs.append(z)
            cs.append(c)
            zss.append(jnp.take(z, inv, axis=0))

        # Fold the k heads into the batch: tot_loss of the reference equals
        # the mean over all K*B rows of (relu(1-u_pos)+relu(1+u_neg))/2.
        z_all = jnp.concatenate(zs, axis=0)                  # (K*b, z_size)
        c_all = jnp.concatenate(cs, axis=0)                  # (K*b, c_size)
        zs_all = jnp.concatenate(zss, axis=0)                # (K*b, z_size)

        n_valid = self.k_predictions * b
        bp = _round_up(n_valid, 8)

        z_all = _pad2d(z_all, bp, self.z_pad)                # f32
        zs_all = _pad2d(zs_all, bp, self.z_pad)              # f32
        c_all = _pad2d(c_all, bp, self.c_pad).astype(jnp.bfloat16)

        return _clapp_fused_loss(z_all, zs_all, c_all, self.w_t_pad,
                                 n_valid, self.tz, self.tc)

    # -- Pure-JAX reference (mirrors the PyTorch forward) ---------------------
    def reference_loss(self, reprs):
        b = reprs.shape[0]
        flat = reprs.reshape(b, -1).astype(jnp.float32)
        w_t = self.weights_t[0]                              # Wpred[0] quirk
        tot = 0.0
        for k in range(self.k_predictions):
            z = jnp.take(flat, self.z_idx[k], axis=1)
            c = jnp.take(flat, self.c_idx[k], axis=1)
            if self.detach_c:
                c = jax.lax.stop_gradient(c)
            zhat = c @ w_t
            u_pos = jnp.sum(z * zhat, axis=-1)
            idx = jax.random.permutation(self.perm_keys[k], b)
            u_neg = jnp.sum(z * zhat[idx], axis=-1)
            tot = tot + (jnp.mean(jax.nn.relu(1.0 - u_pos))
                         + jnp.mean(jax.nn.relu(1.0 + u_neg))) / 2.0
        return tot / self.k_predictions


if __name__ == "__main__":
    key = jax.random.PRNGKey(0)
    b, c_in, leng = 2, 4, 16                  # reprs: (batch, c_in, leng)
    reprs = jax.random.normal(key, (b, c_in, leng), dtype=jnp.float32)

    model = CLAPPUnsupervisedHalfMaskingPallas(
        c_in=c_in, leng=leng, k_predictions=2, prop_hidden=0.5,
        detach_c=False, masking_axis='none', seed=0)

    loss = model(reprs, None)
    jax.block_until_ready(loss)

    ref = model.reference_loss(reprs)
    jax.block_until_ready(ref)

    assert loss.shape == () and bool(jnp.isfinite(loss))
    # bf16 matmul operands vs f32 reference -> loose tolerance.
    assert abs(float(loss) - float(ref)) < 5e-2 * (1.0 + abs(float(ref)))
    print("KERNEL_OK")
</pallas_src>

<mosaic_0001>
module attributes {stable_mosaic.version = 11 : i64} {
  func.func @_clapp_kernel(%arg0: i32, %arg1: i32, %arg2: memref<8x128xf32, #tpu.memory_space<vmem>>, %arg3: memref<8x128xf32, #tpu.memory_space<vmem>>, %arg4: memref<8x128xbf16, #tpu.memory_space<vmem>>, %arg5: memref<128x128xbf16, #tpu.memory_space<vmem>>, %arg6: memref<8x128xf32, #tpu.memory_space<vmem>>, %arg7: memref<8x128xf32, #tpu.memory_space<vmem>>, %arg8: memref<8x1xf32, #tpu.memory_space<vmem>>, %arg9: memref<8x1xf32, #tpu.memory_space<vmem>>) attributes {dimension_semantics = [#tpu.dimension_semantics<arbitrary>, #tpu.dimension_semantics<arbitrary>], iteration_bounds = array<i64: 1, 1>, scalar_prefetch = 0 : i64, scratch_operands = 3 : i64, tpu.core_type = #tpu.core_type<tc>, window_params = [{transform_indices = @transform_0, window_bounds = array<i64: 8, 128>}, {transform_indices = @transform_1, window_bounds = array<i64: 8, 128>}, {transform_indices = @transform_2, window_bounds = array<i64: 8, 128>}, {transform_indices = @transform_3, window_bounds = array<i64: 128, 128>}, {pipeline_mode = #tpu.pipeline_mode<synchronous>, transform_indices = @transform_4, window_bounds = array<i64: 8, 128>}]} {
    %c0_i32 = arith.constant 0 : i32
    %0 = arith.cmpi eq, %arg0, %c0_i32 : i32
    %c0_i32_0 = arith.constant 0 : i32
    %1 = arith.cmpi eq, %arg1, %c0_i32_0 : i32
    %2 = arith.andi %0, %1 : i1
    %3 = arith.extui %2 : i1 to i32
    %c0_i32_1 = arith.constant 0 : i32
    %4 = arith.cmpi ne, %3, %c0_i32_1 : i32
    scf.if %4 {
      %cst_16 = arith.constant 0.000000e+00 : f32
      %22 = vector.broadcast %cst_16 : f32 to vector<8x1xf32>
      %c0_17 = arith.constant 0 : index
      %c0_18 = arith.constant 0 : index
      %23 = vector.load %arg8[%c0_17, %c0_18] : memref<8x1xf32, #tpu.memory_space<vmem>>, vector<8x1xf32>
      tpu.vector_store %arg8[%c0_17, %c0_18], %22 {strides = array<i32>} : memref<8x1xf32, #tpu.memory_space<vmem>>, vector<8x1xf32>,
      %cst_19 = arith.constant 0.000000e+00 : f32
      %24 = vector.broadcast %cst_19 : f32 to vector<8x1xf32>
      %c0_20 = arith.constant 0 : index
      %c0_21 = arith.constant 0 : index
      %25 = vector.load %arg9[%c0_20, %c0_21] : memref<8x1xf32, #tpu.memory_space<vmem>>, vector<8x1xf32>
      tpu.vector_store %arg9[%c0_20, %c0_21], %24 {strides = array<i32>} : memref<8x1xf32, #tpu.memory_space<vmem>>, vector<8x1xf32>,
    } else {
    }
    %c0_i32_2 = arith.constant 0 : i32
    %5 = arith.cmpi eq, %arg1, %c0_i32_2 : i32
    %6 = arith.extui %5 : i1 to i32
    %c0_i32_3 = arith.constant 0 : i32
    %7 = arith.cmpi ne, %6, %c0_i32_3 : i32
    scf.if %7 {
      %cst_16 = arith.constant 0.000000e+00 : f32
      %22 = vector.broadcast %cst_16 : f32 to vector<8x128xf32>
      %c0_17 = arith.constant 0 : index
      %c0_18 = arith.constant 0 : index
      %23 = vector.load %arg7[%c0_17, %c0_18] : memref<8x128xf32, #tpu.memory_space<vmem>>, vector<8x128xf32>
      tpu.vector_store %arg7[%c0_17, %c0_18], %22 {strides = array<i32>} : memref<8x128xf32, #tpu.memory_space<vmem>>, vector<8x128xf32>,
    } else {
    }
    %c0 = arith.constant 0 : index
    %c0_4 = arith.constant 0 : index
    %8 = vector.load %arg7[%c0, %c0_4] : memref<8x128xf32, #tpu.memory_space<vmem>>, vector<8x128xf32>
    %c0_5 = arith.constant 0 : index
    %c0_6 = arith.constant 0 : index
    %9 = vector.load %arg4[%c0_5, %c0_6] : memref<8x128xbf16, #tpu.memory_space<vmem>>, vector<8x128xbf16>
    %c0_7 = arith.constant 0 : index
    %c0_8 = arith.constant 0 : index
    %10 = vector.load %arg5[%c0_7, %c0_8] : memref<128x128xbf16, #tpu.memory_space<vmem>>, vector<128x128xbf16>
    %cst = arith.constant dense<0.000000e+00> : vector<8x128xf32>
    %11 = tpu.matmul %9, %10, %cst {dimension_numbers = #tpu.dot_dimension_numbers<[1], [0], [0], [1], [0, 0, 1, 1], [], []>} : vector<8x128xbf16>, vector<128x128xbf16>, vector<8x128xf32> -> vector<8x128xf32>
    %12 = arith.addf %8, %11 : vector<8x128xf32>
    %c0_9 = arith.constant 0 : index
    %c0_10 = arith.constant 0 : index
    %13 = vector.load %arg7[%c0_9, %c0_10] : memref<8x128xf32, #tpu.memory_space<vmem>>, vector<8x128xf32>
    tpu.vector_store %arg7[%c0_9, %c0_10], %12 {strides = array<i32>} : memref<8x128xf32, #tpu.memory_space<vmem>>, vector<8x128xf32>,
    %c0_i32_11 = arith.constant 0 : i32
    %14 = arith.cmpi eq, %arg1, %c0_i32_11 : i32
    %15 = arith.extui %14 : i1 to i32
    %c0_i32_12 = arith.constant 0 : i32
    %16 = arith.cmpi ne, %15, %c0_i32_12 : i32
    scf.if %16 {
      %c0_16 = arith.constant 0 : index
      %c0_17 = arith.constant 0 : index
      %22 = vector.load %arg7[%c0_16, %c0_17] : memref<8x128xf32, #tpu.memory_space<vmem>>, vector<8x128xf32>
      %c0_18 = arith.constant 0 : index
      %c0_19 = arith.constant 0 : index
      %23 = vector.load %arg8[%c0_18, %c0_19] : memref<8x1xf32, #tpu.memory_space<vmem>>, vector<8x1xf32>
      %c0_20 = arith.constant 0 : index
      %c0_21 = arith.constant 0 : index
      %24 = vector.load %arg2[%c0_20, %c0_21] : memref<8x128xf32, #tpu.memory_space<vmem>>, vector<8x128xf32>
      %25 = arith.mulf %24, %22 : vector<8x128xf32>
      %cst_22 = arith.constant dense<0.000000e+00> : vector<8xf32>
      %26 = vector.multi_reduction <add>, %25, %cst_22 [1] : vector<8x128xf32> to vector<8xf32>
      %27 = vector.shape_cast %26 : vector<8xf32> to vector<8x1xf32>
      %28 = arith.addf %23, %27 : vector<8x1xf32>
      %c0_23 = arith.constant 0 : index
      %c0_24 = arith.constant 0 : index
      %29 = vector.load %arg8[%c0_23, %c0_24] : memref<8x1xf32, #tpu.memory_space<vmem>>, vector<8x1xf32>
      tpu.vector_store %arg8[%c0_23, %c0_24], %28 {strides = array<i32>} : memref<8x1xf32, #tpu.memory_space<vmem>>, vector<8x1xf32>,
      %c0_25 = arith.constant 0 : index
      %c0_26 = arith.constant 0 : index
      %30 = vector.load %arg9[%c0_25, %c0_26] : memref<8x1xf32, #tpu.memory_space<vmem>>, vector<8x1xf32>
      %c0_27 = arith.constant 0 : index
      %c0_28 = arith.constant 0 : index
      %31 = vector.load %arg3[%c0_27, %c0_28] : memref<8x128xf32, #tpu.memory_space<vmem>>, vector<8x128xf32>
      %32 = arith.mulf %31, %22 : vector<8x128xf32>
      %cst_29 = arith.constant dense<0.000000e+00> : vector<8xf32>
      %33 = vector.multi_reduction <add>, %32, %cst_29 [1] : vector<8x128xf32> to vector<8xf32>
      %34 = vector.shape_cast %33 : vector<8xf32> to vector<8x1xf32>
      %35 = arith.addf %30, %34 : vector<8x1xf32>
      %c0_30 = arith.constant 0 : index
      %c0_31 = arith.constant 0 : index
      %36 = vector.load %arg9[%c0_30, %c0_31] : memref<8x1xf32, #tpu.memory_space<vmem>>, vector<8x1xf32>
      tpu.vector_store %arg9[%c0_30, %c0_31], %35 {strides = array<i32>} : memref<8x1xf32, #tpu.memory_space<vmem>>, vector<8x1xf32>,
    } else {
    }
    %c0_i32_13 = arith.constant 0 : i32
    %17 = arith.cmpi eq, %arg0, %c0_i32_13 : i32
    %c0_i32_14 = arith.constant 0 : i32
    %18 = arith.cmpi eq, %arg1, %c0_i32_14 : i32
    %19 = arith.andi %17, %18 : i1
    %20 = arith.extui %19 : i1 to i32
    %c0_i32_15 = arith.constant 0 : i32
    %21 = arith.cmpi ne, %20, %c0_i32_15 : i32
    scf.if %21 {
      %22 = tpu.iota {dimensions = array<i32: 0>} : vector<8x1xi32>
      %c4_i32 = arith.constant 4 : i32
      %23 = vector.broadcast %c4_i32 : i32 to vector<8x1xi32>
      %24 = arith.cmpi slt, %22, %23 : vector<8x1xi32>
      %c0_16 = arith.constant 0 : index
      %c0_17 = arith.constant 0 : index
      %25 = vector.load %arg8[%c0_16, %c0_17] : memref<8x1xf32, #tpu.memory_space<vmem>>, vector<8x1xf32>
      %cst_18 = arith.constant 1.000000e+00 : f32
      %26 = vector.broadcast %cst_18 : f32 to vector<8x1xf32>
      %27 = arith.subf %26, %25 : vector<8x1xf32>
      %cst_19 = arith.constant 0.000000e+00 : f32
      %28 = vector.broadcast %cst_19 : f32 to vector<8x1xf32>
      %29 = arith.maximumf %27, %28 : vector<8x1xf32>
      %c0_20 = arith.constant 0 : index
      %c0_21 = arith.constant 0 : index
      %30 = vector.load %arg9[%c0_20, %c0_21] : memref<8x1xf32, #tpu.memory_space<vmem>>, vector<8x1xf32>
      %cst_22 = arith.constant 1.000000e+00 : f32
      %31 = vector.broadcast %cst_22 : f32 to vector<8x1xf32>
      %32 = arith.addf %31, %30 : vector<8x1xf32>
      %cst_23 = arith.constant 0.000000e+00 : f32
      %33 = vector.broadcast %cst_23 : f32 to vector<8x1xf32>
      %34 = arith.maximumf %32, %33 : vector<8x1xf32>
      %35 = arith.addf %29, %34 : vector<8x1xf32>
      %cst_24 = arith.constant 0.000000e+00 : f32
      %36 = vector.broadcast %cst_24 : f32 to vector<8x1xf32>
      %37 = arith.select %24, %35, %36 : vector<8x1xi1>, vector<8x1xf32>
      %38 = vector.shape_cast %37 : vector<8x1xf32> to vector<1x8x1xf32>
      %cst_25 = arith.constant dense<0.000000e+00> : vector<1xf32>
      %39 = vector.multi_reduction <add>, %38, %cst_25 [1, 2] : vector<1x8x1xf32> to vector<1xf32>
      %40 = vector.shape_cast %39 : vector<1xf32> to vector<1x1x1xf32>
      %41 = vector.extract %40[0, 0, 0] : f32 from vector<1x1x1xf32>
      %cst_26 = arith.constant 8.000000e+00 : f32
      %42 = arith.divf %41, %cst_26 : f32
      %43 = vector.broadcast %42 : f32 to vector<8x128xf32>
      %c0_27 = arith.constant 0 : index
      %c0_28 = arith.constant 0 : index
      %44 = vector.load %arg6[%c0_27, %c0_28] : memref<8x128xf32, #tpu.memory_space<vmem>>, vector<8x128xf32>
      tpu.vector_store %arg6[%c0_27, %c0_28], %43 {strides = array<i32>} : memref<8x128xf32, #tpu.memory_space<vmem>>, vector<8x128xf32>,
    } else {
    }
    return
  }
  func.func @transform_0(%arg0: i32, %arg1: i32) -> (i32, i32) {
    %c0_i32 = arith.constant 0 : i32
    %c0_i32_0 = arith.constant 0 : i32
    return %c0_i32, %arg0 : i32, i32
  }
  func.func @transform_1(%arg0: i32, %arg1: i32) -> (i32, i32) {
    %c0_i32 = arith.constant 0 : i32
    %c0_i32_0 = arith.constant 0 : i32
    return %c0_i32, %arg0 : i32, i32
  }
  func.func @transform_2(%arg0: i32, %arg1: i32) -> (i32, i32) {
    %c0_i32 = arith.constant 0 : i32
    %c0_i32_0 = arith.constant 0 : i32
    return %c0_i32, %arg1 : i32, i32
  }
  func.func @transform_3(%arg0: i32, %arg1: i32) -> (i32, i32) {
    %c0_i32 = arith.constant 0 : i32
    return %arg1, %arg0 : i32, i32
  }
  func.func @transform_4(%arg0: i32, %arg1: i32) -> (i32, i32) {
    %c0_i32 = arith.constant 0 : i32
    %c0_i32_0 = arith.constant 0 : i32
    %c0_i32_1 = arith.constant 0 : i32
    return %c0_i32, %c0_i32_0 : i32, i32
  }
}

</mosaic_0001>

<bundles_post_ra>
// kernel: tpu_custom_call.1
= control target key start
LH: loop header
LB: loop body
LE: loop exit
PB: predicated region body
PF: predicated region fallthrough
CT: control target
= control target key end

     0   :  { %9 = vsyncpa [#allocation6], 0  ;;  %s479_s0 = inlined_call_operand.hbm [shape: f32[8,128], index: 0, kind: input, shape index: {}]   ;;  %s480_s1 = inlined_call_operand.hbm [shape: f32[8,128], index: 1, kind: input, shape index: {}]   ;;  %s481_s2 = inlined_call_operand.hbm [shape: bf16[8,128], index: 2, kind: input, shape index: {}]   ;;  %s482_s3 = inlined_call_operand.hbm [shape: bf16[128,128], index: 3, kind: input, shape index: {}]   ;;  %s483_s4 = inlined_call_operand.hbm [shape: f32[8,128], index: 4, kind: output, shape index: {}]  }
   0x1   :  { %10 = vsyncpa [#allocation9], 0 }
   0x2   :  { %11 = vsyncpa [#allocation12], 0  ;;  %s29_s17 = sshll.u32 %s480_s1, 4  ;;  %s30_s17 = int_to_ptr.hbm [resolvable:$true] %s29_s17 }
   0x3   :  { %12 = vsyncpa [#allocation7], 0  ;;  %s425_s18 = smov [#allocation8]   ;;  %s18_s22 = sshll.u32 %s479_s0, 4  ;;  %s19_s22 = int_to_ptr.hbm [resolvable:$true] %s18_s22 }
   0x4   :  { %s31_s19 = sshll.u32 %s425_s18, 4  ;;  %s426_s23 = smov [#allocation5]   ;;  %s32_s19 = int_to_ptr.vmem [resolvable:$true] %s31_s19 }
   0x5   :  { %34 = dma.hbm_to_vmem [thread:$0]  %s30_s17, 128, %s32_s19, [#allocation9]  }
   0x6   :  { %s20_s24 = sshll.u32 %s426_s23, 4  ;;  %s40_s27 = sshll.u32 %s481_s2, 4  ;;  %s21_s24 = int_to_ptr.vmem [resolvable:$true] %s20_s24  ;;  %s41_s27 = int_to_ptr.hbm [resolvable:$true] %s40_s27 }
   0x7   :  { %23 = dma.hbm_to_vmem [thread:$0]  %s19_s22, 128, %s21_s24, [#allocation6]  }
   0x8   :  { %s50_s29 = sshll.u32 %s482_s3, 4  ;;  %s427_s30 = smov [#allocation10]   ;;  %s51_s29 = int_to_ptr.hbm [resolvable:$true] %s50_s29 }
   0x9   :  { %s42_s5 = sshll.u32 %s427_s30, 4  ;;  %s428_s0 = smov [#allocation11]   ;;  %s43_s5 = int_to_ptr.vmem [resolvable:$true] %s42_s5 }
   0xa   :  { %45 = dma.hbm_to_vmem [thread:$0]  %s41_s27, 64, %s43_s5, [#allocation9]  }
   0xb   :  { %s52_s6 = sshll.u32 %s428_s0, 4  ;;  %s429_s7 = smov 64   ;;  %s53_s6 = int_to_ptr.vmem [resolvable:$true] %s52_s6 }
   0xc   :  { %s430_s8 = smov 4  }
   0xd   :  { %58 = dma.hbm_to_vmem [thread:$0]  %s51_s29, 1024, %s53_s6, [#allocation12], %s429_s7, %s429_s7, %s430_s8  }
   0xe   :  { %417 = dma.done.wait [#allocation6], 128  }
   0xf   :  { %418 = vsyncadd [#allocation6], 4294967168 }
  0x10   :  { %419 = dma.done.wait [#allocation9], 192  }
  0x11   :  { %420 = vsyncadd [#allocation9], 4294967104 }
  0x12   :  { %421 = dma.done.wait [#allocation12], 1024  }
  0x13   :  { %422 = vsyncadd [#allocation12], 4294966272  ;;  %v281_v0 = vld [vmem:[#allocation11 + $0x38] sm:$0xff]  ;;  %v280_v1 = vld [vmem:[#allocation11 + $0x30] sm:$0xff]  ;;  %vm81_vm0 = vcmask 7168   ;;  %v431_v9 = vmov 0.0   ;;  %v190_v22 = vlaneseq }
  0x14   :  { %154 = vmatpush.bf16.msra.mxu0 %v281_v0  ;;  %v279_v2 = vld [vmem:[#allocation11 + $0x28] sm:$0xff]  ;;  %v278_v3 = vld [vmem:[#allocation11 + $0x20] sm:$0xff]  ;;  %v277_v4 = vld [vmem:[#allocation11 + $0x18] sm:$0xff]  ;;  %82 = vst.msk [vmem:[#allocation3] sm:$0xff] %vm81_vm0, %v431_v9  ;;  %v432_v33 = vmov 8.0   ;;  %s433_s2 = smov [#allocation13]  }
  0x15   :  { %v276_v5 = vld [vmem:[#allocation11 + $0x10] sm:$0xff]  ;;  %v275_v6 = vld [vmem:[#allocation11 + $0x8] sm:$0xff]  ;;  %v274_v7 = vld [vmem:[#allocation11] sm:$0xff]  ;;  %83 = vst.msk [vmem:[#allocation4] sm:$0xff] %vm81_vm0, %v431_v9  ;;  %v191_v25 = vshrl.u32 %v190_v22, 7  ;;  %295 = vrcp.f32 %v432_v33  ;;  %s228_s3 = sshll.u32 %s433_s2, 4  ;;  %s229_s3 = int_to_ptr.vmem [resolvable:$true] %s228_s3 }
  0x16   :  { %v89_v8 = vld [vmem:[#allocation10] sm:$0xf]  ;;  %v174_v10 = vld [vmem:[#allocation5] sm:$0xff]  ;;  %v182_v13 = vld [vmem:[#allocation8] sm:$0xff]  ;;  %s230_s12 = sshll.u32 %s483_s4, 4  ;;  %s231_s12 = int_to_ptr.hbm [resolvable:$true] %s230_s12 }
  0x17   :  { %vm192_vm1 = vcmp.lt.s32.totalorder %v191_v25, 4 }
  0x18   :  { %155 = vmatpush.bf16.msra.mxu0 %v280_v1 }
  0x1b   :  { %v173_v16 = vld [vmem:[#allocation3] sm:$0xff]  ;;  %v296_v34 = vpop.eup %295 }
  0x1c   :  { %156 = vmatpush.bf16.msra.mxu0 %v279_v2  ;;  %v181_v19 = vld [vmem:[#allocation4] sm:$0xff]  ;;  %v213_v35 = vmul.f32 8.0, %v296_v34  ;;  %vm217_vm2 = vweird.f32 %v296_v34 }
  0x1e   :  { %v214_v36 = vsub.f32 1.0, %v213_v35 }
  0x20   :  { %157 = vmatpush.bf16.msra.mxu0 %v278_v3  ;;  %v215_v40 = vmul.f32 %v296_v34, %v214_v36 }
  0x22   :  { %v216_v43 = vadd.f32 %v296_v34, %v215_v40 }
  0x24   :  { %158 = vmatpush.bf16.msra.mxu0 %v277_v4  ;;  %v218_v46 = vsel %vm217_vm2, %v296_v34, %v216_v43 }
  0x28   :  { %159 = vmatpush.bf16.msra.mxu0 %v276_v5 }
  0x2c   :  { %160 = vmatpush.bf16.msra.mxu0 %v275_v6 }
  0x30   :  { %161 = vmatpush.bf16.msra.mxu0 %v274_v7 }
  0x33   :  { %162 = vmatmul.bf16.vlgmr.msra.gmra.mxu0 %v89_v8 }
  0xb0   :  { %v163_v11 = vpop.f32.mrf.mxu0 }
  0xb1   :  { %v175_v12 = vmul.f32 %v174_v10, %v163_v11  ;;  %v183_v15 = vmul.f32 %v182_v13, %v163_v11 }
  0xb3   :  { %176 = vadd.xlane.f32.xlu0 %v175_v12 }
  0xb8   :  { %v165_v14 = vpop.f32.mrf.mxu0 }
  0xbb   :  { %184 = vadd.xlane.f32.xlu0 %v183_v15 }
 0x126   :  { %v177_v17 = vpop.xlane.xlu0 %176 }
 0x127   :  { %v178_v18 = vadd.f32 %v177_v17, %v173_v16 }
 0x129   :  { %180 = vst.msk [vmem:[#allocation3] sm:$0xff] %vm81_vm0, %v178_v18 }
 0x12e   :  { %v185_v20 = vpop.xlane.xlu0 %184 }
 0x12f   :  { %v186_v21 = vadd.f32 %v185_v20, %v181_v19 }
 0x130   :  { %v193_v23 = vld [vmem:[#allocation3] sm:$0xff] }
 0x131   :  { %187 = vst.msk [vmem:[#allocation4] sm:$0xff] %vm81_vm0, %v186_v21  ;;  %v194_v24 = vsub.f32 1.0, %v193_v23 }
 0x133   :  { %v195_v28 = vmax.f32 %v194_v24, 0.0 }
 0x138   :  { %v196_v26 = vld [vmem:[#allocation4] sm:$0xff] }
 0x139   :  { %v197_v27 = vadd.f32 1.0, %v196_v26 }
 0x13b   :  { %v198_v29 = vmax.f32 %v197_v27, 0.0 }
 0x13d   :  { %v199_v30 = vadd.f32 %v198_v29, %v195_v28 }
 0x13f   :  { %v200_v31 = vsel %vm192_vm1, %v199_v30, 0.0 }
 0x140   :  { %v202_v32 = vsel %vm81_vm0, %v200_v31, 0.0 }
 0x141   :  { %203 = vadd.xlane.f32.xlu1 %v202_v32 }
 0x1b4   :  { %v204_v37 = vpop.xlane.xlu1 %203 }
 0x1b5   :  { %v205_v38 = vrot.slane %v204_v37, 4 }
 0x1b7   :  { %v206_v39 = vadd.f32 %v205_v38, %v204_v37 }
 0x1b9   :  { %v207_v41 = vrot.slane %v206_v39, 2 }
 0x1bb   :  { %v208_v42 = vadd.f32 %v207_v41, %v206_v39 }
 0x1bd   :  { %v209_v44 = vrot.slane %v208_v42, 1 }
 0x1bf   :  { %v210_v45 = vadd.f32 %v209_v44, %v208_v42 }
 0x1c1   :  { %282 = vpush %v210_v45 }
 0x1c2   :  { %284 = vpush %v218_v46 }
 0x1f2   :  { %s283_s9 = spop %282 }
 0x1f3   :  { %s285_s13 = spop %284 }
 0x1f4   :  { %s220_s14 = smul.f32 %s285_s13, %s283_s9 }
 0x1f6   :  { %v221_v47 = vstv %s220_s14 }
 0x1f7   :  { %222 = vst [vmem:[#allocation13] sm:$0xff] %v221_v47 }
 0x1f8   :  { %233 = dma.vmem_to_hbm [thread:$0]  %s229_s3, 128, %s231_s12, [#allocation7]  }
 0x1f9   :  { %423 = dma.done.wait [#allocation7], 128  }
 0x1fa   :  { %424 = vsyncadd [#allocation7], 4294967168 }
 0x1fb   :  { %238 = vsyncpa [#allocation6], 1 }
 0x1fc   :  { %239 = vsyncpa [#allocation9], 1 }
 0x1fd   :  { %240 = vsyncpa [#allocation12], 1 }
 0x1fe   :  { %241 = vsyncpa [#allocation7], 1 }

</bundles_post_ra>
